<compile_context>
chip_gen: v5e
topology: v5e:2x2
jax: 0.10.0
libtpu: 0.0.40
codegen_flags: <defaults>
</compile_context>

<pallas_src>
import jax
import jax.numpy as jnp
import numpy as np
from jax.experimental import pallas as pl
from jax.experimental.pallas import tpu as pltpu


def _normalize_kernel(scale_ref, bias_ref, x_ref, o_ref):
    # x_ref: (Rblk, HWblk) in the input dtype; scale/bias: (Rblk, 1) f32.
    x = x_ref[...].astype(jnp.float32)                      # batch.float()
    o_ref[...] = (x * scale_ref[...] + bias_ref[...]).astype(o_ref.dtype)


def _vmem_capacity_bytes():
    """Physical VMEM per TensorCore; conservative fallback if the query fails."""
    try:
        info = pltpu.get_tpu_info()
        for attr in ("vmem_capacity_bytes", "vmem_capacity", "vmem_bytes"):
            v = getattr(info, attr, None)
            if v:
                return int(v)
    except Exception:
        pass
    return 64 * 1024 * 1024      # v7x per-TC value == smallest of all gens


def _choose_tiles(R, HW, C, in_item, out_item, budget_bytes):
    """Pick (rblk, hwblk) so 2*(in_tile + out_tile) fits the VMEM budget.

    Layout constraints honored:
      rblk % C == 0 and (rblk % 8 == 0 or rblk == R)
      hwblk % 128 == 0 or hwblk == HW
    """
    # Preferred row granularity: full sublane packing for the input dtype
    # (32 rows for 8-bit, 16 for 16-bit, 8 for 32-bit), and a multiple of C.
    sub = {1: 32, 2: 16}.get(in_item, 8)
    row_unit = int(np.lcm(C, sub))
    hw_unit = 128 if HW % 128 == 0 else HW

    per_elem = 2 * (in_item + out_item)        # double-buffered input + output
    max_elems = max(budget_bytes // per_elem, 8 * 128)
    # Cap the output tile at ~16 MiB: past that per-step overhead is already
    # <1% and we would just burn VMEM headroom.
    max_elems = min(max_elems, (16 << 20) // out_item)

    # Rows first (full-HW row blocks are fully contiguous in HBM).
    rows_fit = max_elems // HW
    if rows_fit >= R:
        rblk = R
    elif rows_fit >= row_unit:
        rblk = (rows_fit // row_unit) * row_unit
    else:
        rblk = min(row_unit, R)   # minimal legal row block; split lanes below

    # Columns.
    if rblk * HW <= max_elems or hw_unit == HW:
        # Note: if HW is not a multiple of 128 we cannot split the lane axis;
        # for pathologically large non-128-aligned frames this can exceed the
        # VMEM budget (rare; would need wrapper-side padding).
        hwblk = HW
    else:
        cols_fit = max(max_elems // rblk, hw_unit)
        hwblk = min(max((cols_fit // hw_unit) * hw_unit, hw_unit), HW)

    # Guarantee >= 2 grid steps when the shape allows, so the parallel axes
    # can shard across v7x's two TensorCores (no-op cost on v5e/v6e).
    steps = ((R + rblk - 1) // rblk) * ((HW + hwblk - 1) // hwblk)
    if steps < 2:
        if hw_unit == 128 and HW >= 256:
            hwblk = max(((HW // 2) // 128) * 128, 128)
        elif R >= 2 * row_unit:
            rblk = max(((R // 2) // row_unit) * row_unit, row_unit)
        # else: input too small to split — single step is fine.
    return rblk, hwblk


def image_normalize(x, mean, std, *, out_dtype=jnp.float32):
    """Pallas ImageNormalizer.forward: (x.float()/255 - mean[c]) / std[c].

    x:    (B, C, H, W), any real/int dtype (cast to f32 in-kernel, like
          `batch.float()`).
    mean: per-channel mean, shape (C,) or (C, 1, 1).
    std:  per-channel std,  shape (C,) or (C, 1, 1).
    out_dtype: float32 matches the PyTorch module; bfloat16 is the
          low-HBM-traffic fast path if downstream tolerates it (~1.6x faster).
    """
    B, C, H, W = x.shape
    R, HW = B * C, H * W

    mean = jnp.asarray(mean, jnp.float32).reshape(-1)
    std = jnp.asarray(std, jnp.float32).reshape(-1)
    assert mean.shape == (C,) and std.shape == (C,)

    # Fold into one FMA: (x/255 - mean)/std == x*(1/(255*std)) + (-mean/std)
    scale_c = 1.0 / (255.0 * std)
    bias_c = -mean / std

    in_item = jnp.dtype(x.dtype).itemsize
    out_item = jnp.dtype(out_dtype).itemsize

    vmem_cap = _vmem_capacity_bytes()
    vmem_limit = min(64 * 1024 * 1024, int(vmem_cap * 0.65))
    budget = int(vmem_limit * 0.85)                 # headroom for the compiler

    rblk, hwblk = _choose_tiles(R, HW, C, in_item, out_item, budget)

    # Per-row constants for one row block: channel of global row r is r % C,
    # and every block starts at a multiple of C (rblk % C == 0), so a single
    # (rblk, 1) vector with a constant index_map serves every grid step.
    reps = rblk // C
    scale_rows = jnp.tile(scale_c, reps).reshape(rblk, 1)
    bias_rows = jnp.tile(bias_c, reps).reshape(rblk, 1)

    x2 = x.reshape(R, HW)
    grid = (pl.cdiv(R, rblk), pl.cdiv(HW, hwblk))

    out = pl.pallas_call(
        _normalize_kernel,
        out_shape=jax.ShapeDtypeStruct((R, HW), out_dtype),
        grid=grid,
        in_specs=[
            pl.BlockSpec((rblk, 1), lambda i, j: (0, 0)),      # scale (resident)
            pl.BlockSpec((rblk, 1), lambda i, j: (0, 0)),      # bias  (resident)
            pl.BlockSpec((rblk, hwblk), lambda i, j: (i, j)),  # x tile
        ],
        out_specs=pl.BlockSpec((rblk, hwblk), lambda i, j: (i, j)),
        compiler_params=pltpu.CompilerParams(
            dimension_semantics=("parallel", "parallel"),
            vmem_limit_bytes=vmem_limit,
        ),
    )(scale_rows, bias_rows, x2)

    return out.reshape(B, C, H, W)


if __name__ == "__main__":
    key = jax.random.PRNGKey(0)
    B, C, H, W = 2, 4, 16, 16

    # Deterministic per-channel mean/std buffers (module __init__ arguments).
    mean = jnp.asarray(np.linspace(0.4, 0.5, C), dtype=jnp.float32)
    std = jnp.asarray(np.linspace(0.2, 0.3, C), dtype=jnp.float32)

    # Deterministic "image" batch; feed native uint8 (no wrapper widening).
    xf = jax.random.uniform(key, (B, C, H, W), dtype=jnp.float32) * 255.0
    x_u8 = jnp.round(xf).astype(jnp.uint8)

    def ref_fn(x):
        return (x.astype(jnp.float32) / 255.0
                - mean[None, :, None, None]) / std[None, :, None, None]

    # Test 1: uint8 input, f32 output (matches the PyTorch module).
    out_u8 = jax.block_until_ready(image_normalize(x_u8, mean, std))
    np.testing.assert_allclose(
        np.asarray(out_u8), np.asarray(ref_fn(x_u8)), rtol=1e-5, atol=1e-5
    )

    # Test 2: float32 input.
    out_f32 = jax.block_until_ready(image_normalize(xf, mean, std))
    np.testing.assert_allclose(
        np.asarray(out_f32), np.asarray(ref_fn(xf)), rtol=1e-5, atol=1e-5
    )

    # Test 3: bf16 fast-path output (low HBM writeback traffic).
    out_bf16 = jax.block_until_ready(
        image_normalize(x_u8, mean, std, out_dtype=jnp.bfloat16)
    )
    np.testing.assert_allclose(
        np.asarray(out_bf16).astype(np.float32), np.asarray(ref_fn(x_u8)),
        rtol=2e-2, atol=2e-2,
    )

    print("KERNEL_OK")
</pallas_src>

<mosaic_0001>
module attributes {stable_mosaic.version = 11 : i64} {
  func.func @_normalize_kernel(%arg0: i32, %arg1: i32, %arg2: memref<8x1xf32, #tpu.memory_space<vmem>>, %arg3: memref<8x1xf32, #tpu.memory_space<vmem>>, %arg4: memref<8x128xi8, #tpu.memory_space<vmem>>, %arg5: memref<8x128xf32, #tpu.memory_space<vmem>>) attributes {dimension_semantics = [#tpu.dimension_semantics<parallel>, #tpu.dimension_semantics<parallel>], iteration_bounds = array<i64: 1, 2>, scalar_prefetch = 0 : i64, scratch_operands = 0 : i64, tpu.core_type = #tpu.core_type<tc>, window_params = [{pipeline_mode = #tpu.pipeline_mode<synchronous>, transform_indices = @transform_0, window_bounds = array<i64: 8, 1>}, {pipeline_mode = #tpu.pipeline_mode<synchronous>, transform_indices = @transform_1, window_bounds = array<i64: 8, 1>}, {transform_indices = @transform_2, window_bounds = array<i64: 8, 128>}, {transform_indices = @transform_3, window_bounds = array<i64: 8, 128>}]} {
    %c0 = arith.constant 0 : index
    %c0_0 = arith.constant 0 : index
    %0 = vector.load %arg4[%c0, %c0_0] : memref<8x128xi8, #tpu.memory_space<vmem>>, vector<8x128xi8>
    %1 = arith.uitofp %0 : vector<8x128xi8> to vector<8x128xf32>
    %c0_1 = arith.constant 0 : index
    %c0_2 = arith.constant 0 : index
    %2 = vector.load %arg2[%c0_1, %c0_2] : memref<8x1xf32, #tpu.memory_space<vmem>>, vector<8x1xf32>
    %3 = vector.broadcast %2 : vector<8x1xf32> to vector<8x128xf32>
    %4 = arith.mulf %1, %3 : vector<8x128xf32>
    %c0_3 = arith.constant 0 : index
    %c0_4 = arith.constant 0 : index
    %5 = vector.load %arg3[%c0_3, %c0_4] : memref<8x1xf32, #tpu.memory_space<vmem>>, vector<8x1xf32>
    %6 = vector.broadcast %5 : vector<8x1xf32> to vector<8x128xf32>
    %7 = arith.addf %4, %6 : vector<8x128xf32>
    %c0_5 = arith.constant 0 : index
    %c0_6 = arith.constant 0 : index
    %8 = vector.load %arg5[%c0_5, %c0_6] : memref<8x128xf32, #tpu.memory_space<vmem>>, vector<8x128xf32>
    tpu.vector_store %arg5[%c0_5, %c0_6], %7 {strides = array<i32>} : memref<8x128xf32, #tpu.memory_space<vmem>>, vector<8x128xf32>,
    return
  }
  func.func @transform_0(%arg0: i32, %arg1: i32) -> (i32, i32) {
    %c0_i32 = arith.constant 0 : i32
    %c0_i32_0 = arith.constant 0 : i32
    %c0_i32_1 = arith.constant 0 : i32
    return %c0_i32, %c0_i32_0 : i32, i32
  }
  func.func @transform_1(%arg0: i32, %arg1: i32) -> (i32, i32) {
    %c0_i32 = arith.constant 0 : i32
    %c0_i32_0 = arith.constant 0 : i32
    %c0_i32_1 = arith.constant 0 : i32
    return %c0_i32, %c0_i32_0 : i32, i32
  }
  func.func @transform_2(%arg0: i32, %arg1: i32) -> (i32, i32) {
    %c0_i32 = arith.constant 0 : i32
    return %arg0, %arg1 : i32, i32
  }
  func.func @transform_3(%arg0: i32, %arg1: i32) -> (i32, i32) {
    %c0_i32 = arith.constant 0 : i32
    return %arg0, %arg1 : i32, i32
  }
}

</mosaic_0001>

<bundles_post_ra>
// kernel: tpu_custom_call.1
= control target key start
LH: loop header
LB: loop body
LE: loop exit
PB: predicated region body
PF: predicated region fallthrough
CT: control target
= control target key end

     0   :  { %8 = vsyncpa [#allocation3], 0  ;;  %s578_s0 = inlined_call_operand.vmem [shape: f32[8,1], index: 0, kind: input, shape index: {}]   ;;  %s579_s1 = inlined_call_operand.vmem [shape: f32[8,1], index: 1, kind: input, shape index: {}]   ;;  %s580_s2 = inlined_call_operand.vmem [shape: u8[8,256], index: 2, kind: input, shape index: {}]   ;;  %s581_s3 = inlined_call_operand.hbm [shape: f32[8,256], index: 3, kind: output, shape index: {}]  }
   0x1   :  { %10 = vsyncpa [#allocation3 + $0x1], 0  ;;  %s475_s12 = smov 0   ;;  %s477_s13 = smov 0  }
   0x2   :  { %s479_s14 = smov 0   ;;  %s481_s15 = smov 0  }
   0x3   :  { %s483_s16 = smov 0   ;;  %s485_s17 = smov 0  }
   0x4 LB: > { %s306_s18 = sadd.s32 4294967295, %s452_s17   ;;  %s307_s19 = sadd.s32 4294967294, %s452_s17   ;;  %s452_s17 = sphi %s485_s17, %s16_s17   ;;  %s448_s16 = sphi %s483_s16, %s588_s16   ;;  %s444_s15 = sphi %s481_s15, %s587_s15   ;;  %s440_s14 = sphi %s479_s14, %s586_s14   ;;  %s436_s13 = sphi %s477_s13, %s585_s13   ;;  %s432_s12 = sphi %s475_s12, %s584_s12  }
   0x5   : > { %s25_s20 = sadd.s32 1, %s448_s16  ;;  %s107_s21 = sadd.s32 1, %s440_s14 }
   0x6   : > { %p26_p0 = scmp.ge.s32.totalorder %s25_s20, 2  ;;  %p117_p1 = scmp.ne.s32.totalorder %s440_s14, %s436_s13 }
   0x7   : > { %p118_p2 = scmp.eq.s32.totalorder %s306_s18, 1  ;;  %p123_p3 = scmp.ne.s32.totalorder %s436_s13, %s432_s12 }
   0x8   : > { %s590_s20 = smov (%p26_p0, %s25_s20), 0  ;;  %p124_p5 = scmp.eq.s32.totalorder %s307_s19, 1 }
   0x9   : > { %p515_p4 = por %p118_p2, %p117_p1  ;;  %s103_s23 = ssub.s32 %s448_s16, %s590_s20 }
   0xa   : > { %p310_p6 = scmp.ge.s32.totalorder %s452_s17, 1  ;;  %p105_p7 = scmp.eq.s32.totalorder %s103_s23, 0 }
   0xb   : > { %p522_p8 = por %p124_p5, %p123_p3  ;;  %p159_p9 = scmp.lt.s32.totalorder %s452_s17, 3 }
   0xc   : > { %s528_s25 = scalar_select %p105_p7, %s440_s14, %s107_s21  }
   0xd   : > { %p160_p10 = pnand %p310_p6, %p159_p9 }
   0xe   : > { %p188_p11 = scmp.lt.s32.totalorder (!%p160_p10), %s444_s15, 1  ;;  %s183_s8 = sand.u32 (!%p160_p10), 1, %s436_s13  }
   0xf   : > { %163 = sbr.rel (%p160_p10) target bundleno = 150 (0x96), region = 32  ;;  %s311_s9 = sshll.u32 (!%p160_p10), %s183_s8, 3 }
  0x10   : > { %s314_s10 = sshll.u32 (!%p160_p10), %s444_s15, 3  ;;  %s185_s21 = scalar_lea.vmem (!%p160_p10), [#allocation2], %s311_s9 }
  0x11   : > { %s226_s19 = scalar_lea.hbm (!%p160_p10), %s581_s3, %s314_s10  ;;  %s228_s23 = sshll.u32 (!%p160_p10), %s185_s21, 4  ;;  %s229_s23 = int_to_ptr.vmem [resolvable:$true] %s228_s23 }
  0x12   : > { %s230_s26 = sshll.u32 (!%p160_p10), %s226_s19, 4  ;;  %s214_s27 = scalar_lea.sflag (!%p160_p10), [#allocation3], %s183_s8  ;;  %s231_s26 = int_to_ptr.hbm [resolvable:$true] %s230_s26 }
  0x13   : > { %s388_s28 = sshra.s32 (!%p160_p10), %s231_s26, 4  ;;  %s389_s28 = int_to_ptr.hbm [resolvable:$true] %s388_s28 }
  0x14   : > { %v198_v0 = vld [vmem:[%s578_s0] sm:$0xff]  ;;  %v454_v1 = vmov 0   ;;  %s189_s30 = scalar_select %p188_p11, %s444_s15, 1 }
  0x15   : > { %373 = vset.pattern.permute.xlu0 %v454_v1  ;;  %v205_v2 = vld [vmem:[%s579_s1] sm:$0xff]  ;;  %s390_s29 = scalar_lea.hbm %s389_s28, 8  ;;  %p395_p1 = scmp.lt.s32.totalorder %s389_s28, %s581_s3 }
  0x16   : > { %201 = vperm.xlu0 %373, %v198_v0   ;;  %s312_s4 = sshll.u32 %s189_s30, 1  ;;  %p391_p12 = scmp.ne.s32.totalorder %s389_s28, %s390_s29 }
  0x17   : > { %s193_s7 = scalar_lea.vmem %s580_s2, %s312_s4  ;;  %s394_s4 = scalar_lea.hbm %s581_s3, 16 }
  0x18   : > { %v194_v3 = vld [vmem:[%s193_s7] sm:$0x3]  ;;  %p392_p13 = pnand %p391_p12, %p515_p4  ;;  %p396_p2 = scmp.lt.s32.totalorder %s394_s4, %s390_s29 }
  0x19   : > { %v195_v4 = vunpack.c.0.s8 %v194_v3 }
  0x1a   : > { %p393_p0 = pneg %p392_p13  ;;  %p397_p3 = por %p396_p2, %p395_p1 }
  0x1b   : > { %v196_v5 = vand.u32 255, %v195_v4 }
  0x1c   : > { %p398_p5 = pnand %p397_p3, %p393_p0 }
  0x1d   : > { %v197_v7 = vcvt.s32.f32 %v196_v5 }
  0x1e   : > { %208 = vperm.xlu0 %373, %v205_v2  }
  0x88   : > { %v202_v6 = vpop.permute.xlu0 %201 }
  0x89   : > { %v204_v8 = vmul.f32 %v202_v6, %v197_v7 }
  0x90   : > { %v209_v9 = vpop.permute.xlu0 %208 }
  0x91   : > { %v211_v10 = vadd.f32 %v209_v9, %v204_v8 }
  0x93   : > { %212 = vst [vmem:[%s185_s21] sm:$0xff] %v211_v10 }
  0x94   : > { %401 = shalt.err (!%p398_p5)
}
  0x95   : > { %317 = dma.vmem_to_hbm [thread:$0]  (%p515_p4), %s229_s23, 128, %s231_s26, %s214_s27  }
  0x96 PF: > { %p323_p6 = scmp.ge.s32.totalorder %s452_s17, 2  ;;  %s242_s7 = sand.u32 1, %s432_s12  }
  0x97   : > { %s243_s8 = scalar_lea.sflag [#allocation3], %s242_s7 }
  0x98   : > { %p320_p7 = pnand %p323_p6, %p522_p8 }
  0x9a   : > { %p321_p9 = pneg %p320_p7 }
  0x9c   : > { %427 = dma.done.wait (%p321_p9), %s243_s8, 128  }
  0x9d   : > { %429 = vsyncadd (%p321_p9), %s243_s8, 4294967168  ;;  %s16_s17 = sadd.s32 1, %s452_s17   ;;  %s584_s12 = smov %s436_s13 }
  0x9e   : > { %p13_p10 = scmp.ge.s32.totalorder %s16_s17, 4   ;;  %s585_s13 = smov %s440_s14 }
  0x9f   : > { %s586_s14 = smov %s528_s25  ;;  %s587_s15 = smov %s448_s16 }
  0xa0   : > { %s588_s16 = smov %s590_s20  ;;  %15 = sbr.rel (!%p13_p10) target bundleno = 4 (0x4), region = 67 }
  0xa5   :  { %249 = vsyncpa [#allocation3], 1 }
  0xa6   :  { %251 = vsyncpa [#allocation3 + $0x1], 1 }

</bundles_post_ra>
